<compile_context>
chip_gen: v7x
topology: tpu7x:2x2x1
jax: 0.10.0
libtpu: 0.0.40
codegen_flags: <defaults>
</compile_context>

<pallas_src>
import functools

import jax
import jax.numpy as jnp
from jax.experimental import pallas as pl
from jax.experimental.pallas import tpu as pltpu

NEG_INF = -1e30        # mask value for the 118 padded logit lanes
OUT_PAD = 128          # lane-dense padded logit width (real classes = 10)
HIDDEN = 64
IN_DIM = 28 * 28


def net_kernel(x_ref, w1_ref, b1_ref, w2_ref, b2_ref, w3_ref, b3_ref,
               w4_ref, b4_ref, o_ref):
    # x arrives in its HBM dtype (f32 or bf16); cast to bf16 in-kernel (free on the VPU
    # under the DMA bound) so no separate XLA cast pass over x is needed.
    x = x_ref[...].astype(jnp.bfloat16)
    # fc1 + relu (f32 accumulation on the MXU)
    h = jnp.dot(x, w1_ref[...], preferred_element_type=jnp.float32) + b1_ref[...]
    h = jnp.maximum(h, 0.0).astype(jnp.bfloat16)
    # fc2 + relu
    h = jnp.dot(h, w2_ref[...], preferred_element_type=jnp.float32) + b2_ref[...]
    h = jnp.maximum(h, 0.0).astype(jnp.bfloat16)
    # fc3 + relu
    h = jnp.dot(h, w3_ref[...], preferred_element_type=jnp.float32) + b3_ref[...]
    h = jnp.maximum(h, 0.0).astype(jnp.bfloat16)
    # fc4 (padded to 128 lanes; pad-lane bias = -1e30 masks them out of the softmax)
    logits = jnp.dot(h, w4_ref[...], preferred_element_type=jnp.float32) + b4_ref[...]
    # numerically stable log_softmax over dim=1 (f32 math, bf16 store)
    m = jnp.max(logits, axis=1, keepdims=True)
    shifted = logits - m
    lse = jnp.log(jnp.sum(jnp.exp(shifted), axis=1, keepdims=True))
    o_ref[...] = (shifted - lse).astype(o_ref.dtype)


def prepare_params(params):
    """One-time weight prep: bf16 casts + fc4 padded to 128 output lanes.

    Call once and cache the result; the per-call path then touches weights only
    via the kernel's resident VMEM copies.
    """
    w1 = params["w1"].astype(jnp.bfloat16)
    w2 = params["w2"].astype(jnp.bfloat16)
    w3 = params["w3"].astype(jnp.bfloat16)
    b1, b2, b3 = params["b1"], params["b2"], params["b3"]
    w4 = jnp.zeros((HIDDEN, OUT_PAD), jnp.bfloat16).at[:, :10].set(
        params["w4"].astype(jnp.bfloat16))
    b4 = jnp.full((1, OUT_PAD), NEG_INF, jnp.float32).at[:, :10].set(params["b4"])
    return (w1, b1, w2, b2, w3, b3, w4, b4)


def _round8(n):
    return max(8, ((n + 7) // 8) * 8)


@functools.partial(jax.jit, static_argnames=("tb_max",))
def net_forward(x, prepared, *, tb_max=2048):
    """x: (B, 784) float32 or bfloat16.  prepared: output of prepare_params()."""
    B = x.shape[0]
    # Pad the batch to a multiple of 8 (sublane) so any B is legal.
    Bp = _round8(B)
    if Bp != B:
        x = jnp.pad(x, ((0, Bp - B), (0, 0)))

    # Batch tile: multiple of 8, capped at tb_max.  When B >= 16, also cap at
    # round8(cdiv(Bp, 2)) so the grid has >= 2 steps and the "parallel" batch axis
    # can shard across v7x's two TensorCores (v5e/v6e have one TC; harmless there).
    if Bp >= 16:
        TB = min(tb_max, _round8(pl.cdiv(Bp, 2)))
    else:
        TB = min(tb_max, Bp)
    grid = (pl.cdiv(Bp, TB),)

    w1, b1, w2, b2, w3, b3, w4, b4 = prepared

    # Weights/biases: whole-array blocks, constant index map -> VMEM-resident across
    # grid steps.
    const_spec = lambda a: pl.BlockSpec(a.shape, lambda i: (0,) * a.ndim)

    flops = 2 * Bp * (IN_DIM * HIDDEN + HIDDEN * HIDDEN * 2 + HIDDEN * OUT_PAD)
    bytes_accessed = (
        x.size * x.dtype.itemsize                                  # x in (f32 or bf16)
        + (w1.size + w2.size + w3.size + w4.size) * 2              # bf16 weights
        + (b1.size + b2.size + b3.size + b4.size) * 4              # f32 biases
        + Bp * OUT_PAD * 2)                                        # bf16 padded out

    out = pl.pallas_call(
        net_kernel,
        out_shape=jax.ShapeDtypeStruct((Bp, OUT_PAD), jnp.bfloat16),
        grid=grid,
        in_specs=[
            pl.BlockSpec((TB, IN_DIM), lambda i: (i, 0)),
            const_spec(w1), const_spec(b1),
            const_spec(w2), const_spec(b2),
            const_spec(w3), const_spec(b3),
            const_spec(w4), const_spec(b4),
        ],
        out_specs=pl.BlockSpec((TB, OUT_PAD), lambda i: (i, 0)),
        compiler_params=pltpu.CompilerParams(
            dimension_semantics=("parallel",),
            vmem_limit_bytes=32 * 1024 * 1024),
        cost_estimate=pl.CostEstimate(
            flops=flops,
            transcendentals=Bp * (OUT_PAD + 1),
            bytes_accessed=bytes_accessed),
    )(x, w1, b1, w2, b2, w3, b3, w4, b4)

    # Slice away pad lanes/rows and restore f32 inside the same jit (only 40 B/row;
    # fuses with the consumer).  Lanes 10..127 of the raw buffer hold ~-1e30.
    return out[:B, :10].astype(jnp.float32)


def init_params(key):
    """Deterministic PyTorch-Linear-style init: U(-1/sqrt(fan_in), 1/sqrt(fan_in))."""
    dims = [(IN_DIM, HIDDEN), (HIDDEN, HIDDEN), (HIDDEN, HIDDEN), (HIDDEN, 10)]
    params = {}
    for idx, (fan_in, fan_out) in enumerate(dims, start=1):
        key, kw, kb = jax.random.split(key, 3)
        bound = 1.0 / (fan_in ** 0.5)
        params[f"w{idx}"] = jax.random.uniform(
            kw, (fan_in, fan_out), jnp.float32, -bound, bound)
        params[f"b{idx}"] = jax.random.uniform(
            kb, (1, fan_out), jnp.float32, -bound, bound)
    return params


def matched_reference(x, params):
    """XLA reference with the SAME bf16/f32 mixed precision (incl. bf16 output store)."""
    w1, b1, w2, b2, w3, b3, w4, b4 = prepare_params(params)
    xb = x.astype(jnp.bfloat16)
    h = jnp.maximum(jnp.dot(xb, w1, preferred_element_type=jnp.float32) + b1, 0.0)
    h = jnp.maximum(jnp.dot(h.astype(jnp.bfloat16), w2,
                            preferred_element_type=jnp.float32) + b2, 0.0)
    h = jnp.maximum(jnp.dot(h.astype(jnp.bfloat16), w3,
                            preferred_element_type=jnp.float32) + b3, 0.0)
    logits = jnp.dot(h.astype(jnp.bfloat16), w4,
                     preferred_element_type=jnp.float32) + b4
    out = jax.nn.log_softmax(logits, axis=1).astype(jnp.bfloat16).astype(jnp.float32)
    return out[:, :10]


def f32_reference(x, params):
    """Pure f32 reference of the original PyTorch module's math."""
    h = jnp.maximum(x @ params["w1"] + params["b1"], 0.0)
    h = jnp.maximum(h @ params["w2"] + params["b2"], 0.0)
    h = jnp.maximum(h @ params["w3"] + params["b3"], 0.0)
    logits = h @ params["w4"] + params["b4"]
    return jax.nn.log_softmax(logits, axis=1)


if __name__ == "__main__":
    key = jax.random.PRNGKey(0)
    key, kx = jax.random.split(key)
    B = 32  # small self-test batch; >= 16 so the grid has 2 steps (exercises pipelining)
    x = jax.random.normal(kx, (B, IN_DIM), jnp.float32)
    params = init_params(key)

    prepared = prepare_params(params)            # hoisted weight prep (cache this)
    out = net_forward(x, prepared)
    out = jax.block_until_ready(out)

    assert out.shape == (B, 10)
    assert bool(jnp.all(jnp.isfinite(out)))
    # Check vs. precision-matched XLA reference (bf16 matmuls + bf16 output rounding).
    ref_bf = matched_reference(x, params)
    assert jnp.allclose(out, ref_bf, atol=5e-2, rtol=5e-2)
    # Loose sanity check vs. the original f32 math.
    ref_f32 = f32_reference(x, params)
    assert jnp.allclose(out, ref_f32, atol=2e-1, rtol=2e-1)
    print("KERNEL_OK")
</pallas_src>

<mosaic_0001>
module attributes {stable_mosaic.version = 11 : i64} {
  func.func @net_kernel(%arg0: i32, %arg1: memref<16x784xf32, #tpu.memory_space<vmem>>, %arg2: memref<784x64xbf16, #tpu.memory_space<vmem>>, %arg3: memref<1x64xf32, #tpu.memory_space<vmem>>, %arg4: memref<64x64xbf16, #tpu.memory_space<vmem>>, %arg5: memref<1x64xf32, #tpu.memory_space<vmem>>, %arg6: memref<64x64xbf16, #tpu.memory_space<vmem>>, %arg7: memref<1x64xf32, #tpu.memory_space<vmem>>, %arg8: memref<64x128xbf16, #tpu.memory_space<vmem>>, %arg9: memref<1x128xf32, #tpu.memory_space<vmem>>, %arg10: memref<16x128xbf16, #tpu.memory_space<vmem>>) attributes {dimension_semantics = [#tpu.dimension_semantics<parallel>], iteration_bounds = array<i64: 2>, scalar_prefetch = 0 : i64, scratch_operands = 0 : i64, tpu.core_type = #tpu.core_type<tc>, window_params = [{transform_indices = @transform_0, window_bounds = array<i64: 16, 784>}, {pipeline_mode = #tpu.pipeline_mode<synchronous>, transform_indices = @transform_1, window_bounds = array<i64: 784, 64>}, {pipeline_mode = #tpu.pipeline_mode<synchronous>, transform_indices = @transform_2, window_bounds = array<i64: 1, 64>}, {pipeline_mode = #tpu.pipeline_mode<synchronous>, transform_indices = @transform_3, window_bounds = array<i64: 64, 64>}, {pipeline_mode = #tpu.pipeline_mode<synchronous>, transform_indices = @transform_4, window_bounds = array<i64: 1, 64>}, {pipeline_mode = #tpu.pipeline_mode<synchronous>, transform_indices = @transform_5, window_bounds = array<i64: 64, 64>}, {pipeline_mode = #tpu.pipeline_mode<synchronous>, transform_indices = @transform_6, window_bounds = array<i64: 1, 64>}, {pipeline_mode = #tpu.pipeline_mode<synchronous>, transform_indices = @transform_7, window_bounds = array<i64: 64, 128>}, {pipeline_mode = #tpu.pipeline_mode<synchronous>, transform_indices = @transform_8, window_bounds = array<i64: 1, 128>}, {transform_indices = @transform_9, window_bounds = array<i64: 16, 128>}]} {
    %c0 = arith.constant 0 : index
    %c0_0 = arith.constant 0 : index
    %0 = vector.load %arg1[%c0, %c0_0] : memref<16x784xf32, #tpu.memory_space<vmem>>, vector<16x784xf32>
    %1 = arith.truncf %0 : vector<16x784xf32> to vector<16x784xbf16>
    %c0_1 = arith.constant 0 : index
    %c0_2 = arith.constant 0 : index
    %2 = vector.load %arg2[%c0_1, %c0_2] : memref<784x64xbf16, #tpu.memory_space<vmem>>, vector<784x64xbf16>
    %cst = arith.constant dense<0.000000e+00> : vector<16x64xf32>
    %3 = tpu.matmul %1, %2, %cst {dimension_numbers = #tpu.dot_dimension_numbers<[1], [0], [0], [1], [0, 0, 1, 1], [], []>} : vector<16x784xbf16>, vector<784x64xbf16>, vector<16x64xf32> -> vector<16x64xf32>
    %c0_3 = arith.constant 0 : index
    %c0_4 = arith.constant 0 : index
    %4 = vector.load %arg3[%c0_3, %c0_4] : memref<1x64xf32, #tpu.memory_space<vmem>>, vector<1x64xf32>
    %5 = vector.broadcast %4 : vector<1x64xf32> to vector<16x64xf32>
    %6 = arith.addf %3, %5 : vector<16x64xf32>
    %cst_5 = arith.constant 0.000000e+00 : f32
    %7 = vector.broadcast %cst_5 : f32 to vector<16x64xf32>
    %8 = arith.maximumf %6, %7 : vector<16x64xf32>
    %9 = arith.truncf %8 : vector<16x64xf32> to vector<16x64xbf16>
    %c0_6 = arith.constant 0 : index
    %c0_7 = arith.constant 0 : index
    %10 = vector.load %arg4[%c0_6, %c0_7] : memref<64x64xbf16, #tpu.memory_space<vmem>>, vector<64x64xbf16>
    %cst_8 = arith.constant dense<0.000000e+00> : vector<16x64xf32>
    %11 = tpu.matmul %9, %10, %cst_8 {dimension_numbers = #tpu.dot_dimension_numbers<[1], [0], [0], [1], [0, 0, 1, 1], [], []>} : vector<16x64xbf16>, vector<64x64xbf16>, vector<16x64xf32> -> vector<16x64xf32>
    %c0_9 = arith.constant 0 : index
    %c0_10 = arith.constant 0 : index
    %12 = vector.load %arg5[%c0_9, %c0_10] : memref<1x64xf32, #tpu.memory_space<vmem>>, vector<1x64xf32>
    %13 = vector.broadcast %12 : vector<1x64xf32> to vector<16x64xf32>
    %14 = arith.addf %11, %13 : vector<16x64xf32>
    %cst_11 = arith.constant 0.000000e+00 : f32
    %15 = vector.broadcast %cst_11 : f32 to vector<16x64xf32>
    %16 = arith.maximumf %14, %15 : vector<16x64xf32>
    %17 = arith.truncf %16 : vector<16x64xf32> to vector<16x64xbf16>
    %c0_12 = arith.constant 0 : index
    %c0_13 = arith.constant 0 : index
    %18 = vector.load %arg6[%c0_12, %c0_13] : memref<64x64xbf16, #tpu.memory_space<vmem>>, vector<64x64xbf16>
    %cst_14 = arith.constant dense<0.000000e+00> : vector<16x64xf32>
    %19 = tpu.matmul %17, %18, %cst_14 {dimension_numbers = #tpu.dot_dimension_numbers<[1], [0], [0], [1], [0, 0, 1, 1], [], []>} : vector<16x64xbf16>, vector<64x64xbf16>, vector<16x64xf32> -> vector<16x64xf32>
    %c0_15 = arith.constant 0 : index
    %c0_16 = arith.constant 0 : index
    %20 = vector.load %arg7[%c0_15, %c0_16] : memref<1x64xf32, #tpu.memory_space<vmem>>, vector<1x64xf32>
    %21 = vector.broadcast %20 : vector<1x64xf32> to vector<16x64xf32>
    %22 = arith.addf %19, %21 : vector<16x64xf32>
    %cst_17 = arith.constant 0.000000e+00 : f32
    %23 = vector.broadcast %cst_17 : f32 to vector<16x64xf32>
    %24 = arith.maximumf %22, %23 : vector<16x64xf32>
    %25 = arith.truncf %24 : vector<16x64xf32> to vector<16x64xbf16>
    %c0_18 = arith.constant 0 : index
    %c0_19 = arith.constant 0 : index
    %26 = vector.load %arg8[%c0_18, %c0_19] : memref<64x128xbf16, #tpu.memory_space<vmem>>, vector<64x128xbf16>
    %cst_20 = arith.constant dense<0.000000e+00> : vector<16x128xf32>
    %27 = tpu.matmul %25, %26, %cst_20 {dimension_numbers = #tpu.dot_dimension_numbers<[1], [0], [0], [1], [0, 0, 1, 1], [], []>} : vector<16x64xbf16>, vector<64x128xbf16>, vector<16x128xf32> -> vector<16x128xf32>
    %c0_21 = arith.constant 0 : index
    %c0_22 = arith.constant 0 : index
    %28 = vector.load %arg9[%c0_21, %c0_22] : memref<1x128xf32, #tpu.memory_space<vmem>>, vector<1x128xf32>
    %29 = vector.broadcast %28 : vector<1x128xf32> to vector<16x128xf32>
    %30 = arith.addf %27, %29 : vector<16x128xf32>
    %cst_23 = arith.constant dense<0xFF800000> : vector<16xf32>
    %31 = vector.multi_reduction <maximumf>, %30, %cst_23 [1] : vector<16x128xf32> to vector<16xf32>
    %32 = vector.shape_cast %31 : vector<16xf32> to vector<16x1xf32>
    %33 = vector.broadcast %32 : vector<16x1xf32> to vector<16x128xf32>
    %34 = arith.subf %30, %33 : vector<16x128xf32>
    %35 = math.exp %34 : vector<16x128xf32>
    %cst_24 = arith.constant dense<0.000000e+00> : vector<16xf32>
    %36 = vector.multi_reduction <add>, %35, %cst_24 [1] : vector<16x128xf32> to vector<16xf32>
    %37 = vector.shape_cast %36 : vector<16xf32> to vector<16x1xf32>
    %38 = math.log %37 : vector<16x1xf32>
    %39 = vector.broadcast %38 : vector<16x1xf32> to vector<16x128xf32>
    %40 = arith.subf %34, %39 : vector<16x128xf32>
    %41 = arith.truncf %40 : vector<16x128xf32> to vector<16x128xbf16>
    %c0_25 = arith.constant 0 : index
    %c0_26 = arith.constant 0 : index
    %42 = vector.load %arg10[%c0_25, %c0_26] : memref<16x128xbf16, #tpu.memory_space<vmem>>, vector<16x128xbf16>
    tpu.vector_store %arg10[%c0_25, %c0_26], %41 {strides = array<i32>} : memref<16x128xbf16, #tpu.memory_space<vmem>>, vector<16x128xbf16>,
    return
  }
  func.func @transform_0(%arg0: i32) -> (i32, i32) {
    %c0_i32 = arith.constant 0 : i32
    %c0_i32_0 = arith.constant 0 : i32
    return %arg0, %c0_i32 : i32, i32
  }
  func.func @transform_1(%arg0: i32) -> (i32, i32) {
    %c0_i32 = arith.constant 0 : i32
    %c0_i32_0 = arith.constant 0 : i32
    %c0_i32_1 = arith.constant 0 : i32
    return %c0_i32, %c0_i32_0 : i32, i32
  }
  func.func @transform_2(%arg0: i32) -> (i32, i32) {
    %c0_i32 = arith.constant 0 : i32
    %c0_i32_0 = arith.constant 0 : i32
    %c0_i32_1 = arith.constant 0 : i32
    return %c0_i32, %c0_i32_0 : i32, i32
  }
  func.func @transform_3(%arg0: i32) -> (i32, i32) {
    %c0_i32 = arith.constant 0 : i32
    %c0_i32_0 = arith.constant 0 : i32
    %c0_i32_1 = arith.constant 0 : i32
    return %c0_i32, %c0_i32_0 : i32, i32
  }
  func.func @transform_4(%arg0: i32) -> (i32, i32) {
    %c0_i32 = arith.constant 0 : i32
    %c0_i32_0 = arith.constant 0 : i32
    %c0_i32_1 = arith.constant 0 : i32
    return %c0_i32, %c0_i32_0 : i32, i32
  }
  func.func @transform_5(%arg0: i32) -> (i32, i32) {
    %c0_i32 = arith.constant 0 : i32
    %c0_i32_0 = arith.constant 0 : i32
    %c0_i32_1 = arith.constant 0 : i32
    return %c0_i32, %c0_i32_0 : i32, i32
  }
  func.func @transform_6(%arg0: i32) -> (i32, i32) {
    %c0_i32 = arith.constant 0 : i32
    %c0_i32_0 = arith.constant 0 : i32
    %c0_i32_1 = arith.constant 0 : i32
    return %c0_i32, %c0_i32_0 : i32, i32
  }
  func.func @transform_7(%arg0: i32) -> (i32, i32) {
    %c0_i32 = arith.constant 0 : i32
    %c0_i32_0 = arith.constant 0 : i32
    %c0_i32_1 = arith.constant 0 : i32
    return %c0_i32, %c0_i32_0 : i32, i32
  }
  func.func @transform_8(%arg0: i32) -> (i32, i32) {
    %c0_i32 = arith.constant 0 : i32
    %c0_i32_0 = arith.constant 0 : i32
    %c0_i32_1 = arith.constant 0 : i32
    return %c0_i32, %c0_i32_0 : i32, i32
  }
  func.func @transform_9(%arg0: i32) -> (i32, i32) {
    %c0_i32 = arith.constant 0 : i32
    %c0_i32_0 = arith.constant 0 : i32
    return %arg0, %c0_i32 : i32, i32
  }
}

</mosaic_0001>

<bundles_post_ra>
// kernel: net_forward.1
= control target key start
LH: loop header
LB: loop body
LE: loop exit
PB: predicated region body
PF: predicated region fallthrough
CT: control target
= control target key end

     0   :  { %s1627_s30 = smov 0   ;;  %s1885_s0 = inlined_call_operand.vmem [shape: f32[32,784], index: 0, kind: input, shape index: {}]   ;;  %s1886_s1 = inlined_call_operand.vmem [shape: bf16[784,64], index: 1, kind: input, shape index: {}]   ;;  %s1887_s2 = inlined_call_operand.vmem [shape: f32[1,64], index: 2, kind: input, shape index: {}]   ;;  %s1888_s3 = inlined_call_operand.vmem [shape: bf16[64,64], index: 3, kind: input, shape index: {}]   ;;  %s1889_s4 = inlined_call_operand.vmem [shape: f32[1,64], index: 4, kind: input, shape index: {}]   ;;  %s1890_s5 = inlined_call_operand.vmem [shape: bf16[64,64], index: 5, kind: input, shape index: {}]   ;;  %s1891_s6 = inlined_call_operand.vmem [shape: f32[1,64], index: 6, kind: input, shape index: {}]   ;;  %s1892_s7 = inlined_call_operand.vmem [shape: bf16[64,128], index: 7, kind: input, shape index: {}]   ;;  %s1893_s8 = inlined_call_operand.vmem [shape: f32[1,128], index: 8, kind: input, shape index: {}]   ;;  %s1894_s9 = inlined_call_operand.vmem [shape: bf16[32,128], index: 9, kind: output, shape index: {}]  }
   0x1 LB: > { %s1273_s10 = sadd.s32 4294967295, %s1573_s30   ;;  %p1277_p0 = scmp.ge.s32.totalorder %s1573_s30, 1  ;;  %s1573_s30 = sphi %s1627_s30, %s19_s30  }
   0x2   : > { %p289_p1 = scmp.lt.s32.totalorder %s1573_s30, 3 }
   0x4   : > { %p290_p2 = pnand %p1277_p0, %p289_p1 }
   0x5   : > { %v1498_v0 = vld [vmem:[%s1886_s1 + $0x40] sm:$0xff] (!%p290_p2)   ;;  %v1502_v4 = vld [vmem:[%s1886_s1 + $0x48] sm:$0xff] (!%p290_p2)   ;;  %v1506_v8 = vld [vmem:[%s1886_s1 + $0x50] sm:$0xff] (!%p290_p2)   ;;  %s1278_s20 = sshll.u32 (!%p290_p2), %s1273_s10, 1  ;;  %v1575_v43 = vmov (!%p290_p2), 0.0   ;;  %vm1576_vm0 = vmmov (!%p290_p2), 0  }
   0x6   : > { %293 = sbr.rel (%p290_p2) target bundleno = 1270 (0x4f6), region = 56  ;;  %v1499_v1 = vld [vmem:[%s1886_s1] sm:$0xff] (!%p290_p2)   ;;  %1362 = vmatprep.subr.bf16.mxu0 (!%p290_p2), %v1498_v0  ;;  %v1503_v5 = vld [vmem:[%s1886_s1 + $0x8] sm:$0xff] (!%p290_p2)   ;;  %v1507_v9 = vld [vmem:[%s1886_s1 + $0x10] sm:$0xff] (!%p290_p2)   ;;  %p327_p3 = scmp.lt.s32.totalorder (!%p290_p2), %s1278_s20, 3  ;;  %vm760_vm1 = vcmask (!%p290_p2), 130048  }
   0x7   : > { %v1500_v2 = vld [vmem:[%s1886_s1 + $0xc0] sm:$0xff] (!%p290_p2)   ;;  %1363 = vmatpush3.bf16.msra.mxu0 (!%p290_p2), %v1499_v1  ;;  %v1504_v6 = vld [vmem:[%s1886_s1 + $0xc8] sm:$0xff] (!%p290_p2)   ;;  %v1508_v10 = vld [vmem:[%s1886_s1 + $0xd0] sm:$0xff] (!%p290_p2)   ;;  %vm970_vm2 = vcmask (!%p290_p2), 523264  }
   0x8   : > { %v1501_v3 = vld [vmem:[%s1886_s1 + $0x80] sm:$0xff] (!%p290_p2)   ;;  %1384 = vmatprep.subr.bf16.mxu1 (!%p290_p2), %v1500_v2  ;;  %1364 = vmatprep.subr.bf16.mxu0 (!%p290_p2), %v1502_v4  ;;  %v1505_v7 = vld [vmem:[%s1886_s1 + $0x88] sm:$0xff] (!%p290_p2)   ;;  %v1509_v11 = vld [vmem:[%s1886_s1 + $0x90] sm:$0xff] (!%p290_p2)  }
   0x9   : > { %1385 = vmatpush3.bf16.msra.mxu1 (!%p290_p2), %v1501_v3  ;;  %v1510_v12 = vld [vmem:[%s1886_s1 + $0x58] sm:$0xff] (!%p290_p2)   ;;  %v1514_v16 = vld [vmem:[%s1886_s1 + $0x60] sm:$0xff] (!%p290_p2)   ;;  %v1518_v20 = vld [vmem:[%s1886_s1 + $0x68] sm:$0xff] (!%p290_p2)  }
   0xa   : > { %1386 = vmatprep.subr.bf16.mxu1 (!%p290_p2), %v1504_v6  ;;  %v1511_v13 = vld [vmem:[%s1886_s1 + $0x18] sm:$0xff] (!%p290_p2)   ;;  %v1515_v17 = vld [vmem:[%s1886_s1 + $0x20] sm:$0xff] (!%p290_p2)   ;;  %v1519_v21 = vld [vmem:[%s1886_s1 + $0x28] sm:$0xff] (!%p290_p2)  }
   0xb   : > { %1365 = vmatpush3.bf16.msra.mxu0 (!%p290_p2), %v1503_v5  ;;  %v1512_v14 = vld [vmem:[%s1886_s1 + $0xd8] sm:$0xff] (!%p290_p2)   ;;  %v1516_v18 = vld [vmem:[%s1886_s1 + $0xe0] sm:$0xff] (!%p290_p2)   ;;  %v1520_v22 = vld [vmem:[%s1886_s1 + $0xe8] sm:$0xff] (!%p290_p2)  }
   0xc   : > { %1366 = vmatprep.subr.bf16.mxu0 (!%p290_p2), %v1506_v8  ;;  %v1513_v15 = vld [vmem:[%s1886_s1 + $0x98] sm:$0xff] (!%p290_p2)   ;;  %v1517_v19 = vld [vmem:[%s1886_s1 + $0xa0] sm:$0xff] (!%p290_p2)   ;;  %v1521_v23 = vld [vmem:[%s1886_s1 + $0xa8] sm:$0xff] (!%p290_p2)  }
   0xd   : > { %1387 = vmatpush3.bf16.msra.mxu1 %v1505_v7  ;;  %s1896_s20 = smov (!%p327_p3, %s1278_s20), 3  ;;  %v1522_v24 = vld [vmem:[%s1886_s1 + $0x70] sm:$0xff]   ;;  %v1526_v28 = vld [vmem:[%s1886_s1 + $0x78] sm:$0xff]   ;;  %v1530_v38 = vld [vmem:[%s1886_s1 + $0x140] sm:$0xff]  }
   0xe   : > { %1388 = vmatprep.subr.bf16.mxu1 %v1508_v10  ;;  %s1487_s24 = smul.u32 56, %s1896_s20  ;;  %v1523_v25 = vld [vmem:[%s1886_s1 + $0x30] sm:$0xff]   ;;  %v1527_v29 = vld [vmem:[%s1886_s1 + $0x38] sm:$0xff]   ;;  %v1531_v42 = vld [vmem:[%s1886_s1 + $0x100] sm:$0xff]   ;;  %s1281_s13 = sshll.u32 %s1896_s20, 2 }
   0xf   : > { %1367 = vmatpush3.bf16.msra.mxu0 %v1507_v9  ;;  %v1524_v26 = vld [vmem:[%s1886_s1 + $0xf0] sm:$0xff]   ;;  %v1528_v30 = vld [vmem:[%s1886_s1 + $0xf8] sm:$0xff]   ;;  %v1532_v47 = vld [vmem:[%s1886_s1 + $0x148] sm:$0xff]   ;;  %s337_s17 = scalar_lea.vmem %s1894_s9, %s1281_s13 }
  0x10   : > { %1368 = vmatprep.subr.bf16.mxu0 %v1510_v12  ;;  %v1525_v27 = vld [vmem:[%s1886_s1 + $0xb0] sm:$0xff]   ;;  %s1730_s15 = scalar_lea.vmem %s1885_s0, %s1487_s24  ;;  %v1529_v34 = vld [vmem:[%s1886_s1 + $0xb8] sm:$0xff]   ;;  %v1533_v48 = vld [vmem:[%s1886_s1 + $0x108] sm:$0xff]  }
  0x11   : > { %1389 = vmatpush3.bf16.msra.mxu1 %v1509_v11  ;;  %v341_v31 = vld [vmem:[%s1730_s15 + $0x8] sm:$0xff]  ;;  %v348_v32 = vld [vmem:[%s1730_s15 + $0x40] sm:$0xff]  ;;  %v347_v36 = vld [vmem:[%s1730_s15 + $0x38] sm:$0xff] }
  0x12   : > { %1390 = vmatprep.subr.bf16.mxu1 %v1512_v14  ;;  %v355_v33 = vpack.c.bf16 %v348_v32, %v341_v31  ;;  %v340_v35 = vld [vmem:[%s1730_s15] sm:$0xff]  ;;  %v343_v39 = vld [vmem:[%s1730_s15 + $0x18] sm:$0xff]  ;;  %v350_v40 = vld [vmem:[%s1730_s15 + $0x50] sm:$0xff] }
  0x13   : > { %1369 = vmatpush3.bf16.msra.mxu0 %v1511_v13  ;;  %v354_v37 = vpack.c.bf16 %v347_v36, %v340_v35  ;;  %v357_v41 = vpack.c.bf16 %v350_v40, %v343_v39  ;;  %v342_v44 = vld [vmem:[%s1730_s15 + $0x10] sm:$0xff]  ;;  %v349_v45 = vld [vmem:[%s1730_s15 + $0x48] sm:$0xff]  ;;  %v1536_v51 = vld [vmem:[%s1886_s1 + $0x158] sm:$0xff]  }
  0x14   : > { %1370 = vmatprep.subr.bf16.mxu0 %v1514_v16  ;;  %796 = vmatprep.mubr.bf16.mxu0 %v355_v33  ;;  %v356_v46 = vpack.c.bf16 %v349_v45, %v342_v44  ;;  %v1534_v49 = vld [vmem:[%s1886_s1 + $0x150] sm:$0xff]   ;;  %v1537_v52 = vld [vmem:[%s1886_s1 + $0x118] sm:$0xff]   ;;  %v1538_v53 = vld [vmem:[%s1886_s1 + $0x160] sm:$0xff]  }
  0x15   : > { %1391 = vmatpush3.bf16.msra.mxu1 %v1513_v15  ;;  %837 = vmatprep.mubr.bf16.mxu1 %v357_v41  ;;  %v1535_v50 = vld [vmem:[%s1886_s1 + $0x110] sm:$0xff]   ;;  %v1539_v54 = vld [vmem:[%s1886_s1 + $0x120] sm:$0xff]   ;;  %v1540_v55 = vld [vmem:[%s1886_s1 + $0x168] sm:$0xff]  }
  0x16   : > { %1392 = vmatprep.subr.bf16.mxu1 %v1516_v18  ;;  %v1546_v56 = vld [vmem:[%s1886_s1 + $0x180] sm:$0xff]   ;;  %v345_v57 = vld [vmem:[%s1730_s15 + $0x28] sm:$0xff]  ;;  %v1542_v59 = vld [vmem:[%s1886_s1 + $0x170] sm:$0xff]  }
  0x17   : > { %1371 = vmatpush3.bf16.msra.mxu0 %v1515_v17  ;;  %v1541_v58 = vld [vmem:[%s1886_s1 + $0x128] sm:$0xff]   ;;  %v352_v60 = vld [vmem:[%s1730_s15 + $0x60] sm:$0xff]  ;;  %v346_v62 = vld [vmem:[%s1730_s15 + $0x30] sm:$0xff] }
  0x18   : > { %1372 = vmatprep.subr.bf16.mxu0 %v1518_v20  ;;  %v359_v61 = vpack.c.bf16 %v352_v60, %v345_v57  ;;  %v353_v63 = vld [vmem:[%s1730_s15 + $0x68] sm:$0xff]  ;;  %v1543_v1 = vld [vmem:[%s1886_s1 + $0x130] sm:$0xff]   ;;  %v1544_v2 = vld [vmem:[%s1886_s1 + $0x178] sm:$0xff]  }
  0x19   : > { %1393 = vmatpush3.bf16.msra.mxu1 %v1517_v19  ;;  %v360_v0 = vpack.c.bf16 %v353_v63, %v346_v62  ;;  %v1545_v3 = vld [vmem:[%s1886_s1 + $0x138] sm:$0xff]   ;;  %v344_v4 = vld [vmem:[%s1730_s15 + $0x20] sm:$0xff]  ;;  %v1548_v8 = vld [vmem:[%s1888_s3 + $0x8] sm:$0xff]  }
  0x1a   : > { %1394 = vmatprep.subr.bf16.mxu1 %v1520_v22  ;;  %v351_v5 = vld [vmem:[%s1730_s15 + $0x58] sm:$0xff]  ;;  %v1547_v7 = vld [vmem:[%s1888_s3] sm:$0xff]   ;;  %v1549_v9 = vld [vmem:[%s1888_s3 + $0x10] sm:$0xff]  }
  0x1b   : > { %1373 = vmatpush3.bf16.msra.mxu0 %v1519_v21  ;;  %v358_v6 = vpack.c.bf16 %v351_v5, %v344_v4  ;;  %v1550_v10 = vld [vmem:[%s1888_s3 + $0x18] sm:$0xff]   ;;  %v1282_v12 = vld [vmem:[%s1887_s2] ss:$0 sm:$0xff]  ;;  %v1557_v62 = vld [vmem:[%s1892_s7 + $0x10] sm:$0xff]  }
  0x1c   : > { %1374 = vmatprep.subr.bf16.mxu0 %v1522_v24  ;;  %v1551_v45 = vld [vmem:[%s1890_s5] sm:$0xff]   ;;  %v1558_v63 = vld [vmem:[%s1892_s7 + $0x18] sm:$0xff]  }
  0x1d   : > { %1395 = vmatpush3.bf16.msra.mxu1 %v1521_v23 }
  0x1e   : > { %1396 = vmatprep.subr.bf16.mxu1 %v1524_v26 }
  0x1f   : > { %1375 = vmatpush3.bf16.msra.mxu0 %v1523_v25 }
  0x20   : > { %1376 = vmatprep.subr.bf16.mxu0 %v1526_v28 }
  0x21   : > { %1397 = vmatpush3.bf16.msra.mxu1 %v1525_v27 }
  0x22   : > { %1398 = vmatprep.subr.bf16.mxu1 %v1528_v30 }
  0x23   : > { %1377 = vmatpush3.bf16.msra.mxu0 %v1527_v29 }
  0x24   : > { %1406 = vmatprep.subr.bf16.mxu0 %v1530_v38 }
  0x25   : > { %1399 = vmatpush3.bf16.msra.mxu1 %v1529_v34 }
  0x26   : > { %1445 = vmatprep.subr.bf16.mxu1 %v1575_v43  ;;  %797 = vmatmul.mubr.bf16.vlgmr.msra.gmra.mrb[0].mxu0 %v354_v37 }
  0x27   : > { %1407 = vmatpush3.bf16.msra.mxu0 %v1531_v42  ;;  %878 = vmatprep.mubr.bf16.mxu0 %v359_v61 }
  0x28   : > { %838 = vmatmul.mubr.bf16.vlgmr.msra.gmra.mrb[0].mxu1 %v356_v46  ;;  %1408 = vmatprep.subr.bf16.mxu0 %v1532_v47  ;;  %v1552_v47 = vld [vmem:[%s1890_s5 + $0x8] sm:$0xff]  }
  0x29   : > { %1447 = vmatprep.mubr.msk.bf16.mxu1 %vm1576_vm0, %v1575_v43  ;;  %1446 = vmatpush3.bf16.msra.mxu1 %v1546_v56 }
  0x2a   : > { %1451 = vmatprep.subr.bf16.mxu1 %v1575_v43 }
  0x2b   : > { %1409 = vmatpush3.bf16.msra.mxu0 %v1533_v48  ;;  %v1553_v48 = vld [vmem:[%s1890_s5 + $0x10] sm:$0xff]  }
  0x2c   : > { %1410 = vmatprep.subr.bf16.mxu0 %v1534_v49  ;;  %v1554_v49 = vld [vmem:[%s1890_s5 + $0x18] sm:$0xff]  }
  0x2f   : > { %1411 = vmatpush3.bf16.msra.mxu0 %v1535_v50  ;;  %v1555_v50 = vld [vmem:[%s1892_s7] sm:$0xff]  }
  0x30   : > { %1412 = vmatprep.subr.bf16.mxu0 %v1536_v51  ;;  %1448 = vmatmul.mubr.msk.bf16.vlgmr.msra.gmra.mrb[4].mxu1 %vm760_vm1, %v360_v0  ;;  %v1556_v51 = vld [vmem:[%s1892_s7 + $0x8] sm:$0xff]   ;;  %v1339_v0 = vld [vmem:[%s1891_s6] ss:$0 sm:$0xff] }
  0x31   : > { %1459 = vmatprep.mubr.msk.bf16.mxu1 %vm1576_vm0, %v1575_v43  ;;  %1452 = vmatpush3.bf16.msra.mxu1 %v1547_v7 }
  0x32   : > { %1453 = vmatprep.subr.bf16.mxu1 %v1575_v43 }
  0x33   : > { %1413 = vmatpush3.bf16.msra.mxu0 %v1537_v52  ;;  %v1333_v52 = vld [vmem:[%s1889_s4] ss:$0 sm:$0xff] }
  0x34   : > { %1414 = vmatprep.subr.bf16.mxu0 %v1538_v53 }
  0x35   : > { %1454 = vmatpush3.bf16.msra.mxu1 %v1548_v8 }
  0x36   : > { %1455 = vmatprep.subr.bf16.mxu1 %v1575_v43 }
  0x37   : > { %1415 = vmatpush3.bf16.msra.mxu0 %v1539_v54 }
  0x38   : > { %1416 = vmatprep.subr.bf16.mxu0 %v1540_v55 }
  0x39   : > { %1456 = vmatpush3.bf16.msra.mxu1 %v1549_v9 }
  0x3a   : > { %1457 = vmatprep.subr.bf16.mxu1 %v1575_v43 }
  0x3b   : > { %1417 = vmatpush3.bf16.msra.mxu0 %v1541_v58 }
  0x3c   : > { %1418 = vmatprep.subr.bf16.mxu0 %v1542_v59 }
  0x3d   : > { %1458 = vmatpush3.bf16.msra.mxu1 %v1550_v10 }
  0x3e   : > { %1463 = vmatprep.subr.bf16.mxu1 %v1575_v43 }
  0x3f   : > { %1419 = vmatpush3.bf16.msra.mxu0 %v1543_v1 }
  0x40   : > { %1420 = vmatprep.subr.bf16.mxu0 %v1544_v2 }
  0x43   : > { %1421 = vmatpush3.bf16.msra.mxu0 %v1545_v3 }
  0x44   : > { %1475 = vmatprep.subr.bf16.mxu0 %v1575_v43 }
  0x46   : > { %879 = vmatmul.mubr.bf16.vlgmr.msra.gmra.mrb[4].mxu0 %v358_v6 }
  0x47   : > { %1483 = vmatprep.mubr.msk.bf16.mxu0 %vm1576_vm0, %v1575_v43  ;;  %1476 = vmatpush3.bf16.msra.mxu0 %v1555_v50 }
  0x48   : > { %1477 = vmatprep.subr.bf16.mxu0 %v1575_v43 }
  0x4b   : > { %1478 = vmatpush3.bf16.msra.mxu0 %v1556_v51 }
  0x4c   : > { %1479 = vmatprep.subr.bf16.mxu0 %v1575_v43 }
  0x4f   : > { %1480 = vmatpush3.bf16.msra.mxu0 %v1557_v62 }
  0x50   : > { %1481 = vmatprep.subr.bf16.mxu0 %v1575_v43 }
  0x53   : > { %1482 = vmatpush3.bf16.msra.mxu0 %v1558_v63 }
  0xf9   : > { %v1378_v11 = vpop.f32.mrb[0].mxu0 }
  0xfa   : > { %v1379_v13 = vpop.f32.mrb[1].mxu0 }
  0xfb   : > { %v1380_v14 = vadd.f32 %v1379_v13, %v1378_v11  ;;  %v1381_v15 = vpop.f32.mrb[2].mxu0  ;;  %v1400_v16 = vpop.f32.mrb[0].mxu1 }
  0xfc   : > { %v1382_v17 = vpop.f32.mrb[3].mxu0  ;;  %v1401_v20 = vpop.f32.mrb[1].mxu1 }
  0xfd   : > { %v799_v18 = vadd.f32 %v1380_v14, %v1282_v12  ;;  %v1383_v19 = vadd.f32 %v1382_v17, %v1381_v15  ;;  %v1402_v21 = vadd.f32 %v1401_v20, %v1400_v16  ;;  %v1403_v22 = vpop.f32.mrb[2].mxu1 }
  0xfe   : > { %v1404_v24 = vpop.f32.mrb[3].mxu1 }
  0xff   : > { %v802_v23 = vadd.f32 %v1383_v19, %v1282_v12  ;;  %v840_v25 = vadd.f32 %v1402_v21, %v799_v18  ;;  %v1405_v26 = vadd.f32 %v1404_v24, %v1403_v22 }
 0x101   : > { %v843_v27 = vadd.f32 %v1405_v26, %v802_v23 }
 0x103   : > { %v921_v28 = vpop.f32.mrb[4].mxu1 }
 0x104   : > { %v1449_v29 = vpop.f32.mrb[5].mxu1 }
 0x105   : > { %v924_v30 = vpop.f32.mrb[6].mxu1 }
 0x106   : > { %v1450_v31 = vpop.f32.mrb[7].mxu1 }
 0x119   : > { %v1422_v32 = vpop.f32.mrb[4].mxu0 }
 0x11a   : > { %v1423_v33 = vpop.f32.mrb[5].mxu0 }
 0x11b   : > { %v1424_v34 = vadd.f32 %v1423_v33, %v1422_v32  ;;  %v1425_v35 = vpop.f32.mrb[6].mxu0 }
 0x11c   : > { %v1426_v36 = vpop.f32.mrb[7].mxu0 }
 0x11d   : > { %v881_v37 = vadd.f32 %v1424_v34, %v840_v25  ;;  %v1427_v38 = vadd.f32 %v1426_v36, %v1425_v35 }
 0x11f   : > { %v922_v39 = vadd.f32 %v921_v28, %v881_v37  ;;  %v884_v40 = vadd.f32 %v1427_v38, %v843_v27 }
 0x121   : > { %v925_v41 = vadd.f32 %v924_v30, %v884_v40  ;;  %v928_v42 = vmax.f32 %v922_v39, 0.0 }
 0x123   : > { %v929_v44 = vmax.f32 %v925_v41, 0.0 }
 0x125   : > { %v930_v46 = vpack.c.bf16 %v929_v44, %v928_v42 }
 0x127   : > { %1460 = vmatmul.mubr.msk.bf16.vlgmr.msra.gmra.mrb[8].mxu1 %vm970_vm2, %v930_v46 }
 0x128   : > { %1464 = vmatpush3.bf16.msra.mxu1 %v1551_v45  ;;  %1471 = vmatprep.mubr.msk.bf16.mxu1 %vm1576_vm0, %v1575_v43 }
 0x129   : > { %1465 = vmatprep.subr.bf16.mxu1 %v1575_v43 }
 0x12c   : > { %1466 = vmatpush3.bf16.msra.mxu1 %v1552_v47 }
 0x12d   : > { %1467 = vmatprep.subr.bf16.mxu1 %v1575_v43 }
 0x130   : > { %1468 = vmatpush3.bf16.msra.mxu1 %v1553_v48 }
 0x131   : > { %1469 = vmatprep.subr.bf16.mxu1 %v1575_v43  ;;  %v1345_v43 = vld [vmem:[%s1893_s8] ss:$0 sm:$0xff] }
 0x134   : > { %1470 = vmatpush3.bf16.msra.mxu1 %v1554_v49 }
 0x1fa   : > { %v1008_v53 = vpop.f32.mrb[8].mxu1 }
 0x1fb   : > { %v1009_v54 = vadd.f32 %v1333_v52, %v1008_v53  ;;  %v1461_v55 = vpop.f32.mrb[9].mxu1 }
 0x1fc   : > { %v1011_v56 = vpop.f32.mrb[10].mxu1 }
 0x1fd   : > { %v1012_v57 = vadd.f32 %v1333_v52, %v1011_v56  ;;  %v1462_v58 = vpop.f32.mrb[11].mxu1  ;;  %v1015_v59 = vmax.f32 %v1009_v54, 0.0 }
 0x1ff   : > { %v1016_v60 = vmax.f32 %v1012_v57, 0.0 }
 0x201   : > { %v1017_v61 = vpack.c.bf16 %v1016_v60, %v1015_v59 }
 0x203   : > { %1472 = vmatmul.mubr.msk.bf16.vlgmr.msra.gmra.mrb[12].mxu1 %vm970_vm2, %v1017_v61 }
 0x2d6   : > { %v1094_v1 = vpop.f32.mrb[12].mxu1 }
 0x2d7   : > { %v1095_v2 = vadd.f32 %v1339_v0, %v1094_v1  ;;  %v1473_v3 = vpop.f32.mrb[13].mxu1 }
 0x2d8   : > { %v1097_v4 = vpop.f32.mrb[14].mxu1 }
 0x2d9   : > { %v1098_v5 = vadd.f32 %v1339_v0, %v1097_v4  ;;  %v1474_v6 = vpop.f32.mrb[15].mxu1  ;;  %v1101_v7 = vmax.f32 %v1095_v2, 0.0 }
 0x2db   : > { %v1102_v8 = vmax.f32 %v1098_v5, 0.0 }
 0x2dd   : > { %v1103_v9 = vpack.c.bf16 %v1102_v8, %v1101_v7 }
 0x2df   : > { %1484 = vmatmul.mubr.msk.bf16.vlgmr.msra.gmra.mrb[8].mxu0 %vm970_vm2, %v1103_v9 }
 0x3b2   : > { %v1180_v10 = vpop.f32.mrb[8].mxu0 }
 0x3b3   : > { %v1181_v11 = vadd.f32 %v1345_v43, %v1180_v10  ;;  %v1485_v12 = vpop.f32.mrb[9].mxu0 }
 0x3b4   : > { %v1183_v13 = vpop.f32.mrb[10].mxu0 }
 0x3b5   : > { %1187 = vmax.xlane.f32.xlu0 %v1181_v11  ;;  %v1486_v14 = vpop.f32.mrb[11].mxu0  ;;  %v1184_v15 = vadd.f32 %v1345_v43, %v1183_v13 }
 0x3b9   : > { %1189 = vmax.xlane.f32.xlu0 %v1184_v15 }
 0x442   : > { %v1188_v16 = vpop.xlane.xlu0 %1187 }
 0x443   : > { %v1191_v17 = vsub.f32 %v1181_v11, %v1188_v16 }
 0x445   : > { %v1193_v18 = vmul.f32 1.442695, %v1191_v17 }
 0x446   : > { %v1190_v19 = vpop.xlane.xlu0 %1189 }
 0x447   : > { %v1192_v20 = vsub.f32 %v1184_v15, %v1190_v19  ;;  %1559 = vpow2.f32 %v1193_v18 }
 0x449   : > { %v1195_v21 = vmul.f32 1.442695, %v1192_v20 }
 0x44b   : > { %1561 = vpow2.f32 %v1195_v21 }
 0x451   : > { %v1560_v22 = vpop.eup %1559 }
 0x452   : > { %1197 = vadd.xlane.f32.xlu1 %v1560_v22 }
 0x455   : > { %v1562_v23 = vpop.eup %1561 }
 0x456   : > { %1199 = vadd.xlane.f32.xlu1 %v1562_v23 }
 0x4df   : > { %v1198_v24 = vpop.xlane.xlu1 %1197 }
 0x4e0   : > { %1563 = vlog2.f32 %v1198_v24 }
 0x4e3   : > { %v1200_v25 = vpop.xlane.xlu1 %1199 }
 0x4e4   : > { %1565 = vlog2.f32 %v1200_v25 }
 0x4ea   : > { %v1564_v26 = vpop.eup %1563 }
 0x4eb   : > { %v1202_v27 = vmul.f32 0.6931472, %v1564_v26 }
 0x4ed   : > { %v1205_v30 = vsub.f32 %v1191_v17, %v1202_v27 }
 0x4ee   : > { %v1566_v28 = vpop.eup %1565 }
 0x4ef   : > { %v1204_v29 = vmul.f32 0.6931472, %v1566_v28 }
 0x4f1   : > { %v1206_v31 = vsub.f32 %v1192_v20, %v1204_v29 }
 0x4f3   : > { %v1360_v32 = vpack.c.bf16 %v1206_v31, %v1205_v30 }
 0x4f5   : > { %1361 = vst [vmem:[%s337_s17] sm:$0xff] %v1360_v32  }
 0x4f6 PF: > { %s19_s30 = sadd.s32 1, %s1573_s30  }
 0x4f7   : > { %p16_p4 = scmp.ge.s32.totalorder %s19_s30, 4  }
 0x4f9   :  { %18 = sbr.rel (!%p16_p4) target bundleno = 1 (0x1), region = 86 }

</bundles_post_ra>
